<compile_context>
chip_gen: v7x
topology: tpu7x:2x2x1
jax: 0.10.0
libtpu: 0.0.40
codegen_flags: <defaults>
</compile_context>

<pallas_src>
import functools

import jax
import jax.numpy as jnp
from jax.experimental import pallas as pl
from jax.experimental.pallas import tpu as pltpu


_BATCH_ALIGN = 16   # bf16 sublane tile (16, 128): keeps dynamic slices aligned


def _round_up(x, m):
    return (x + m - 1) // m * m


def _pad_to(a, shape):
    pads = [(0, s - d) for d, s in zip(a.shape, shape)]
    return jnp.pad(a, pads)


def rnn_kernel(emb_ref, wih_ref, whh_ref, bias_ref, wfc_ref, bfc_ref,
               out_ref, pre_ref, *, seq_len, batch_g):
    """One batch-group: full RNN recurrence + final Linear.

    emb_ref : (S*Bg, E)  bf16  embedded tokens, time-major within the group
    wih_ref : (E, Hp)    bf16  W_ih^T           (untiled VMEM resident)
    whh_ref : (Hp, Hp)   bf16  W_hh^T           (untiled VMEM resident)
    bias_ref: (1, Hp)    f32   b_ih + b_hh      (untiled VMEM resident)
    wfc_ref : (Hp, Op)   bf16  W_fc^T           (untiled VMEM resident)
    bfc_ref : (1, Op)    f32   b_fc             (untiled VMEM resident)
    out_ref : (Bg, Op)   f32   fc(h_T) for this group (lane-dense store)
    pre_ref : (S*Bg, Hp) bf16  scratch: hoisted input projection
    """
    hidden_pad = whh_ref.shape[1]

    # Hoisted non-recurrent projection for ALL timesteps in one MXU pass:
    #   pre[t*Bg:(t+1)*Bg, :] = x_t @ W_ih^T + (b_ih + b_hh)
    # f32 accumulate + f32 bias add, stored bf16 to halve the O(S) scratch.
    pre_ref[...] = (
        jnp.dot(emb_ref[...], wih_ref[...], preferred_element_type=jnp.float32)
        + bias_ref[...]
    ).astype(jnp.bfloat16)

    h0 = jnp.zeros((batch_g, hidden_pad), jnp.float32)

    # Serial recurrence: only the latency-bound h @ W_hh^T + tanh remains.
    def step(t, h):
        start = pl.multiple_of(t * batch_g, batch_g)   # multiple of 16
        pre_t = pre_ref[pl.ds(start, batch_g), :].astype(jnp.float32)
        # Re-read W_hh from VMEM every step: vld slots are idle in this
        # latency-bound loop, and it avoids pinning an Hp x Hp tile in vregs.
        # (A weight-stationary matmul_push_rhs/acc_lhs/pop variant would also
        # remove the per-step RHS push; deferred for robustness.)
        hw = jnp.dot(h.astype(jnp.bfloat16), whh_ref[...],
                     preferred_element_type=jnp.float32)
        return jnp.tanh(pre_t + hw)     # f32 elementwise path (v5e-safe)

    h_final = jax.lax.fori_loop(0, seq_len, step, h0,
                                unroll=min(seq_len, 8))

    # Final Linear on the last hidden state (lane-dense padded output).
    out_ref[...] = (
        jnp.dot(h_final.astype(jnp.bfloat16), wfc_ref[...],
                preferred_element_type=jnp.float32)
        + bfc_ref[...])


def rnn_forward(x_ids, params):
    """x_ids: (seq_len, batch) int32 token ids -> (batch, output_dim) float32."""
    emb_table = params["embedding"]          # (V, E)
    w_ih_t = params["w_ih_t"]                # (E, H)
    w_hh_t = params["w_hh_t"]                # (H, H)
    b_ih = params["b_ih"]                    # (1, H)
    b_hh = params["b_hh"]                    # (1, H)
    w_fc_t = params["w_fc_t"]                # (H, O)
    b_fc = params["b_fc"]                    # (1, O)

    S, B = x_ids.shape
    E = emb_table.shape[1]
    H = w_hh_t.shape[0]
    O = w_fc_t.shape[1]

    # Two independent batch groups -> one per v7x TensorCore when the batch
    # can fill both halves; single group otherwise (v5e/v6e have one TC).
    G = 2 if B >= 2 * _BATCH_ALIGN else 1
    Bg = _round_up(pl.cdiv(B, G), _BATCH_ALIGN)   # rows per group
    B_total = G * Bg

    H_pad = _round_up(H, 128)                # lane-aligned hidden
    O_pad = _round_up(O, 128)                # lane-dense output store

    # Embedding gather stays in plain JAX (table lookup, not the hot path).
    embedded = jnp.take(emb_table, x_ids, axis=0)        # (S, B, E) f32
    embedded = _pad_to(embedded, (S, B_total, E))        # zero-pad batch rows
    # (S, G, Bg, E) -> (G, S, Bg, E) -> (G, S*Bg, E); bf16 MXU operands.
    emb_g = (embedded.reshape(S, G, Bg, E)
             .transpose(1, 0, 2, 3)
             .reshape(G, S * Bg, E)
             .astype(jnp.bfloat16))

    # Zero-padded weights keep padded hidden lanes exactly 0 through tanh;
    # padded batch rows evolve as tanh(bias + ...) but are sliced off below.
    w_ih_p = _pad_to(w_ih_t, (E, H_pad)).astype(jnp.bfloat16)
    w_hh_p = _pad_to(w_hh_t, (H_pad, H_pad)).astype(jnp.bfloat16)
    bias_p = _pad_to(b_ih + b_hh, (1, H_pad)).astype(jnp.float32)   # folded
    w_fc_p = _pad_to(w_fc_t, (H_pad, O_pad)).astype(jnp.bfloat16)
    b_fc_p = _pad_to(b_fc, (1, O_pad)).astype(jnp.float32)

    # Explicit VMEM budget from the resident set (pre scratch + emb block x2
    # + single-buffered weights + out block x2), capped under v7x physical.
    est_bytes = (
        S * Bg * H_pad * 2                                    # pre scratch
        + 2 * S * Bg * E * 2                                  # emb (2 bufs)
        + (E * H_pad + H_pad * H_pad + H_pad * O_pad) * 2     # weights
        + (H_pad + O_pad) * 4                                 # biases
        + 2 * Bg * O_pad * 4                                  # out (2 bufs)
    )
    vmem_limit = int(min(56 * 2**20, max(16 * 2**20, 1.5 * est_bytes)))
    # TODO(synk): for very long sequences, chunk the `pre` projection with
    # pltpu.emit_pipeline instead of materializing the full (S*Bg, Hp) scratch.

    kernel = functools.partial(rnn_kernel, seq_len=S, batch_g=Bg)

    out_pad = pl.pallas_call(
        kernel,
        out_shape=jax.ShapeDtypeStruct((G, Bg, O_pad), jnp.float32),
        grid_spec=pltpu.PrefetchScalarGridSpec(
            num_scalar_prefetch=0,
            grid=(G,),                                   # one step per group
            in_specs=[
                # Per-group emb slab (the only operand that varies with g).
                pl.BlockSpec((None, S * Bg, E), lambda g: (g, 0, 0)),
                # Weights / biases: whole-array VMEM residents (single copy,
                # no double-buffering; constant across the grid).
                pl.BlockSpec(memory_space=pltpu.MemorySpace.VMEM),
                pl.BlockSpec(memory_space=pltpu.MemorySpace.VMEM),
                pl.BlockSpec(memory_space=pltpu.MemorySpace.VMEM),
                pl.BlockSpec(memory_space=pltpu.MemorySpace.VMEM),
                pl.BlockSpec(memory_space=pltpu.MemorySpace.VMEM),
            ],
            out_specs=pl.BlockSpec((None, Bg, O_pad), lambda g: (g, 0, 0)),
            scratch_shapes=[pltpu.VMEM((S * Bg, H_pad), jnp.bfloat16)],
        ),
        compiler_params=pltpu.CompilerParams(
            # Groups are independent -> sharded across TensorCores on v7x;
            # the serial recurrence lives entirely inside one grid step.
            dimension_semantics=("parallel",),
            vmem_limit_bytes=vmem_limit,
        ),
    )(emb_g, w_ih_p, w_hh_p, bias_p, w_fc_p, b_fc_p)

    # (G, Bg, O_pad) -> (B, O): padding rows were appended at the end, so a
    # flat reshape + slice recovers the original batch order.
    return out_pad.reshape(G * Bg, O_pad)[:B, :O]


def rnn_reference(x_ids, params):
    """Pure-JAX f32 reference matching nn.Embedding -> nn.RNN -> nn.Linear."""
    emb = jnp.take(params["embedding"], x_ids, axis=0)   # (S, B, E)
    S, B, _ = emb.shape
    H = params["w_hh_t"].shape[0]
    h = jnp.zeros((B, H), jnp.float32)
    for t in range(S):
        h = jnp.tanh(emb[t] @ params["w_ih_t"] + params["b_ih"]
                     + h @ params["w_hh_t"] + params["b_hh"])
    return h @ params["w_fc_t"] + params["b_fc"]


def make_params(key, input_dim, embedding_dim, hidden_dim, output_dim):
    ks = jax.random.split(key, 7)
    scale = 0.1
    return {
        "embedding": scale * jax.random.normal(ks[0], (input_dim, embedding_dim), jnp.float32),
        # stored pre-transposed relative to PyTorch's (H, E) / (H, H) / (O, H)
        "w_ih_t": scale * jax.random.normal(ks[1], (embedding_dim, hidden_dim), jnp.float32),
        "w_hh_t": scale * jax.random.normal(ks[2], (hidden_dim, hidden_dim), jnp.float32),
        "b_ih":   scale * jax.random.normal(ks[3], (1, hidden_dim), jnp.float32),
        "b_hh":   scale * jax.random.normal(ks[4], (1, hidden_dim), jnp.float32),
        "w_fc_t": scale * jax.random.normal(ks[5], (hidden_dim, output_dim), jnp.float32),
        "b_fc":   scale * jax.random.normal(ks[6], (1, output_dim), jnp.float32),
    }


if __name__ == "__main__":
    key = jax.random.PRNGKey(0)
    k_param, k_ids = jax.random.split(key)

    INPUT_DIM = 50      # vocab size
    EMB_DIM = 16
    HIDDEN_DIM = 32
    OUTPUT_DIM = 2
    SEQ_LEN = 8
    BATCH = 4

    params = make_params(k_param, INPUT_DIM, EMB_DIM, HIDDEN_DIM, OUTPUT_DIM)
    x_ids = jax.random.randint(k_ids, (SEQ_LEN, BATCH), 0, INPUT_DIM, jnp.int32)

    out = rnn_forward(x_ids, params)
    out = jax.block_until_ready(out)

    ref = rnn_reference(x_ids, params)
    assert out.shape == (BATCH, OUTPUT_DIM)
    # bf16 MXU operands with f32 accumulation: loosened tolerance vs f32 ref.
    assert jnp.allclose(out, ref, atol=2e-2, rtol=2e-2), "mismatch vs reference"

    print("KERNEL_OK")
</pallas_src>

<mosaic_0001>
module attributes {stable_mosaic.version = 11 : i64} {
  func.func @rnn_kernel(%arg0: i32, %arg1: memref<1x128x16xbf16, #tpu.memory_space<vmem>>, %arg2: memref<16x128xbf16, #tpu.memory_space<vmem>>, %arg3: memref<128x128xbf16, #tpu.memory_space<vmem>>, %arg4: memref<1x128xf32, #tpu.memory_space<vmem>>, %arg5: memref<128x128xbf16, #tpu.memory_space<vmem>>, %arg6: memref<1x128xf32, #tpu.memory_space<vmem>>, %arg7: memref<1x16x128xf32, #tpu.memory_space<vmem>>, %arg8: memref<128x128xbf16, #tpu.memory_space<vmem>>) attributes {dimension_semantics = [#tpu.dimension_semantics<parallel>], iteration_bounds = array<i64: 1>, scalar_prefetch = 0 : i64, scratch_operands = 1 : i64, tpu.core_type = #tpu.core_type<tc>, window_params = [{transform_indices = @transform_0, window_bounds = array<i64: 1, 128, 16>}, {pipeline_mode = #tpu.pipeline_mode<synchronous>, transform_indices = @transform_1, window_bounds = array<i64: 16, 128>}, {pipeline_mode = #tpu.pipeline_mode<synchronous>, transform_indices = @transform_2, window_bounds = array<i64: 128, 128>}, {pipeline_mode = #tpu.pipeline_mode<synchronous>, transform_indices = @transform_3, window_bounds = array<i64: 1, 128>}, {pipeline_mode = #tpu.pipeline_mode<synchronous>, transform_indices = @transform_4, window_bounds = array<i64: 128, 128>}, {pipeline_mode = #tpu.pipeline_mode<synchronous>, transform_indices = @transform_5, window_bounds = array<i64: 1, 128>}, {transform_indices = @transform_6, window_bounds = array<i64: 1, 16, 128>}]} {
    %c0 = arith.constant 0 : index
    %c0_0 = arith.constant 0 : index
    %c0_1 = arith.constant 0 : index
    %0 = vector.load %arg1[%c0, %c0_0, %c0_1] : memref<1x128x16xbf16, #tpu.memory_space<vmem>>, vector<1x128x16xbf16>
    %1 = vector.shape_cast %0 : vector<1x128x16xbf16> to vector<128x16xbf16>
    %c0_2 = arith.constant 0 : index
    %c0_3 = arith.constant 0 : index
    %2 = vector.load %arg2[%c0_2, %c0_3] : memref<16x128xbf16, #tpu.memory_space<vmem>>, vector<16x128xbf16>
    %cst = arith.constant dense<0.000000e+00> : vector<128x128xf32>
    %3 = tpu.matmul %1, %2, %cst {dimension_numbers = #tpu.dot_dimension_numbers<[1], [0], [0], [1], [0, 0, 1, 1], [], []>} : vector<128x16xbf16>, vector<16x128xbf16>, vector<128x128xf32> -> vector<128x128xf32>
    %c0_4 = arith.constant 0 : index
    %c0_5 = arith.constant 0 : index
    %4 = vector.load %arg4[%c0_4, %c0_5] : memref<1x128xf32, #tpu.memory_space<vmem>>, vector<1x128xf32>
    %5 = vector.broadcast %4 : vector<1x128xf32> to vector<128x128xf32>
    %6 = arith.addf %3, %5 : vector<128x128xf32>
    %7 = arith.truncf %6 : vector<128x128xf32> to vector<128x128xbf16>
    %c0_6 = arith.constant 0 : index
    %c0_7 = arith.constant 0 : index
    %8 = vector.load %arg8[%c0_6, %c0_7] : memref<128x128xbf16, #tpu.memory_space<vmem>>, vector<128x128xbf16>
    tpu.vector_store %arg8[%c0_6, %c0_7], %7 {strides = array<i32>} : memref<128x128xbf16, #tpu.memory_space<vmem>>, vector<128x128xbf16>,
    %cst_8 = arith.constant 0.000000e+00 : f32
    %9 = vector.broadcast %cst_8 : f32 to vector<16x128xf32>
    %c0_i32 = arith.constant 0 : i32
    %c16_i32 = arith.constant 16 : i32
    %10 = arith.muli %c0_i32, %c16_i32 : i32
    %11 = tpu.assume_multiple %10, 16 : i32
    %12 = arith.index_cast %11 : i32 to index
    %c0_9 = arith.constant 0 : index
    %13 = vector.load %arg8[%12, %c0_9] : memref<128x128xbf16, #tpu.memory_space<vmem>>, vector<16x128xbf16>
    %14 = arith.extf %13 : vector<16x128xbf16> to vector<16x128xf32>
    %15 = arith.truncf %9 : vector<16x128xf32> to vector<16x128xbf16>
    %c0_10 = arith.constant 0 : index
    %c0_11 = arith.constant 0 : index
    %16 = vector.load %arg3[%c0_10, %c0_11] : memref<128x128xbf16, #tpu.memory_space<vmem>>, vector<128x128xbf16>
    %cst_12 = arith.constant dense<0.000000e+00> : vector<16x128xf32>
    %17 = tpu.matmul %15, %16, %cst_12 {dimension_numbers = #tpu.dot_dimension_numbers<[1], [0], [0], [1], [0, 0, 1, 1], [], []>} : vector<16x128xbf16>, vector<128x128xbf16>, vector<16x128xf32> -> vector<16x128xf32>
    %18 = arith.addf %14, %17 : vector<16x128xf32>
    %19 = math.tanh %18 : vector<16x128xf32>
    %c1_i32 = arith.constant 1 : i32
    %c16_i32_13 = arith.constant 16 : i32
    %20 = arith.muli %c1_i32, %c16_i32_13 : i32
    %21 = tpu.assume_multiple %20, 16 : i32
    %22 = arith.index_cast %21 : i32 to index
    %c0_14 = arith.constant 0 : index
    %23 = vector.load %arg8[%22, %c0_14] : memref<128x128xbf16, #tpu.memory_space<vmem>>, vector<16x128xbf16>
    %24 = arith.extf %23 : vector<16x128xbf16> to vector<16x128xf32>
    %25 = arith.truncf %19 : vector<16x128xf32> to vector<16x128xbf16>
    %c0_15 = arith.constant 0 : index
    %c0_16 = arith.constant 0 : index
    %26 = vector.load %arg3[%c0_15, %c0_16] : memref<128x128xbf16, #tpu.memory_space<vmem>>, vector<128x128xbf16>
    %cst_17 = arith.constant dense<0.000000e+00> : vector<16x128xf32>
    %27 = tpu.matmul %25, %26, %cst_17 {dimension_numbers = #tpu.dot_dimension_numbers<[1], [0], [0], [1], [0, 0, 1, 1], [], []>} : vector<16x128xbf16>, vector<128x128xbf16>, vector<16x128xf32> -> vector<16x128xf32>
    %28 = arith.addf %24, %27 : vector<16x128xf32>
    %29 = math.tanh %28 : vector<16x128xf32>
    %c2_i32 = arith.constant 2 : i32
    %c16_i32_18 = arith.constant 16 : i32
    %30 = arith.muli %c2_i32, %c16_i32_18 : i32
    %31 = tpu.assume_multiple %30, 16 : i32
    %32 = arith.index_cast %31 : i32 to index
    %c0_19 = arith.constant 0 : index
    %33 = vector.load %arg8[%32, %c0_19] : memref<128x128xbf16, #tpu.memory_space<vmem>>, vector<16x128xbf16>
    %34 = arith.extf %33 : vector<16x128xbf16> to vector<16x128xf32>
    %35 = arith.truncf %29 : vector<16x128xf32> to vector<16x128xbf16>
    %c0_20 = arith.constant 0 : index
    %c0_21 = arith.constant 0 : index
    %36 = vector.load %arg3[%c0_20, %c0_21] : memref<128x128xbf16, #tpu.memory_space<vmem>>, vector<128x128xbf16>
    %cst_22 = arith.constant dense<0.000000e+00> : vector<16x128xf32>
    %37 = tpu.matmul %35, %36, %cst_22 {dimension_numbers = #tpu.dot_dimension_numbers<[1], [0], [0], [1], [0, 0, 1, 1], [], []>} : vector<16x128xbf16>, vector<128x128xbf16>, vector<16x128xf32> -> vector<16x128xf32>
    %38 = arith.addf %34, %37 : vector<16x128xf32>
    %39 = math.tanh %38 : vector<16x128xf32>
    %c3_i32 = arith.constant 3 : i32
    %c16_i32_23 = arith.constant 16 : i32
    %40 = arith.muli %c3_i32, %c16_i32_23 : i32
    %41 = tpu.assume_multiple %40, 16 : i32
    %42 = arith.index_cast %41 : i32 to index
    %c0_24 = arith.constant 0 : index
    %43 = vector.load %arg8[%42, %c0_24] : memref<128x128xbf16, #tpu.memory_space<vmem>>, vector<16x128xbf16>
    %44 = arith.extf %43 : vector<16x128xbf16> to vector<16x128xf32>
    %45 = arith.truncf %39 : vector<16x128xf32> to vector<16x128xbf16>
    %c0_25 = arith.constant 0 : index
    %c0_26 = arith.constant 0 : index
    %46 = vector.load %arg3[%c0_25, %c0_26] : memref<128x128xbf16, #tpu.memory_space<vmem>>, vector<128x128xbf16>
    %cst_27 = arith.constant dense<0.000000e+00> : vector<16x128xf32>
    %47 = tpu.matmul %45, %46, %cst_27 {dimension_numbers = #tpu.dot_dimension_numbers<[1], [0], [0], [1], [0, 0, 1, 1], [], []>} : vector<16x128xbf16>, vector<128x128xbf16>, vector<16x128xf32> -> vector<16x128xf32>
    %48 = arith.addf %44, %47 : vector<16x128xf32>
    %49 = math.tanh %48 : vector<16x128xf32>
    %c4_i32 = arith.constant 4 : i32
    %c16_i32_28 = arith.constant 16 : i32
    %50 = arith.muli %c4_i32, %c16_i32_28 : i32
    %51 = tpu.assume_multiple %50, 16 : i32
    %52 = arith.index_cast %51 : i32 to index
    %c0_29 = arith.constant 0 : index
    %53 = vector.load %arg8[%52, %c0_29] : memref<128x128xbf16, #tpu.memory_space<vmem>>, vector<16x128xbf16>
    %54 = arith.extf %53 : vector<16x128xbf16> to vector<16x128xf32>
    %55 = arith.truncf %49 : vector<16x128xf32> to vector<16x128xbf16>
    %c0_30 = arith.constant 0 : index
    %c0_31 = arith.constant 0 : index
    %56 = vector.load %arg3[%c0_30, %c0_31] : memref<128x128xbf16, #tpu.memory_space<vmem>>, vector<128x128xbf16>
    %cst_32 = arith.constant dense<0.000000e+00> : vector<16x128xf32>
    %57 = tpu.matmul %55, %56, %cst_32 {dimension_numbers = #tpu.dot_dimension_numbers<[1], [0], [0], [1], [0, 0, 1, 1], [], []>} : vector<16x128xbf16>, vector<128x128xbf16>, vector<16x128xf32> -> vector<16x128xf32>
    %58 = arith.addf %54, %57 : vector<16x128xf32>
    %59 = math.tanh %58 : vector<16x128xf32>
    %c5_i32 = arith.constant 5 : i32
    %c16_i32_33 = arith.constant 16 : i32
    %60 = arith.muli %c5_i32, %c16_i32_33 : i32
    %61 = tpu.assume_multiple %60, 16 : i32
    %62 = arith.index_cast %61 : i32 to index
    %c0_34 = arith.constant 0 : index
    %63 = vector.load %arg8[%62, %c0_34] : memref<128x128xbf16, #tpu.memory_space<vmem>>, vector<16x128xbf16>
    %64 = arith.extf %63 : vector<16x128xbf16> to vector<16x128xf32>
    %65 = arith.truncf %59 : vector<16x128xf32> to vector<16x128xbf16>
    %c0_35 = arith.constant 0 : index
    %c0_36 = arith.constant 0 : index
    %66 = vector.load %arg3[%c0_35, %c0_36] : memref<128x128xbf16, #tpu.memory_space<vmem>>, vector<128x128xbf16>
    %cst_37 = arith.constant dense<0.000000e+00> : vector<16x128xf32>
    %67 = tpu.matmul %65, %66, %cst_37 {dimension_numbers = #tpu.dot_dimension_numbers<[1], [0], [0], [1], [0, 0, 1, 1], [], []>} : vector<16x128xbf16>, vector<128x128xbf16>, vector<16x128xf32> -> vector<16x128xf32>
    %68 = arith.addf %64, %67 : vector<16x128xf32>
    %69 = math.tanh %68 : vector<16x128xf32>
    %c6_i32 = arith.constant 6 : i32
    %c16_i32_38 = arith.constant 16 : i32
    %70 = arith.muli %c6_i32, %c16_i32_38 : i32
    %71 = tpu.assume_multiple %70, 16 : i32
    %72 = arith.index_cast %71 : i32 to index
    %c0_39 = arith.constant 0 : index
    %73 = vector.load %arg8[%72, %c0_39] : memref<128x128xbf16, #tpu.memory_space<vmem>>, vector<16x128xbf16>
    %74 = arith.extf %73 : vector<16x128xbf16> to vector<16x128xf32>
    %75 = arith.truncf %69 : vector<16x128xf32> to vector<16x128xbf16>
    %c0_40 = arith.constant 0 : index
    %c0_41 = arith.constant 0 : index
    %76 = vector.load %arg3[%c0_40, %c0_41] : memref<128x128xbf16, #tpu.memory_space<vmem>>, vector<128x128xbf16>
    %cst_42 = arith.constant dense<0.000000e+00> : vector<16x128xf32>
    %77 = tpu.matmul %75, %76, %cst_42 {dimension_numbers = #tpu.dot_dimension_numbers<[1], [0], [0], [1], [0, 0, 1, 1], [], []>} : vector<16x128xbf16>, vector<128x128xbf16>, vector<16x128xf32> -> vector<16x128xf32>
    %78 = arith.addf %74, %77 : vector<16x128xf32>
    %79 = math.tanh %78 : vector<16x128xf32>
    %c7_i32 = arith.constant 7 : i32
    %c16_i32_43 = arith.constant 16 : i32
    %80 = arith.muli %c7_i32, %c16_i32_43 : i32
    %81 = tpu.assume_multiple %80, 16 : i32
    %82 = arith.index_cast %81 : i32 to index
    %c0_44 = arith.constant 0 : index
    %83 = vector.load %arg8[%82, %c0_44] : memref<128x128xbf16, #tpu.memory_space<vmem>>, vector<16x128xbf16>
    %84 = arith.extf %83 : vector<16x128xbf16> to vector<16x128xf32>
    %85 = arith.truncf %79 : vector<16x128xf32> to vector<16x128xbf16>
    %c0_45 = arith.constant 0 : index
    %c0_46 = arith.constant 0 : index
    %86 = vector.load %arg3[%c0_45, %c0_46] : memref<128x128xbf16, #tpu.memory_space<vmem>>, vector<128x128xbf16>
    %cst_47 = arith.constant dense<0.000000e+00> : vector<16x128xf32>
    %87 = tpu.matmul %85, %86, %cst_47 {dimension_numbers = #tpu.dot_dimension_numbers<[1], [0], [0], [1], [0, 0, 1, 1], [], []>} : vector<16x128xbf16>, vector<128x128xbf16>, vector<16x128xf32> -> vector<16x128xf32>
    %88 = arith.addf %84, %87 : vector<16x128xf32>
    %89 = math.tanh %88 : vector<16x128xf32>
    %c8_i32 = arith.constant 8 : i32
    %90 = arith.truncf %89 : vector<16x128xf32> to vector<16x128xbf16>
    %c0_48 = arith.constant 0 : index
    %c0_49 = arith.constant 0 : index
    %91 = vector.load %arg5[%c0_48, %c0_49] : memref<128x128xbf16, #tpu.memory_space<vmem>>, vector<128x128xbf16>
    %cst_50 = arith.constant dense<0.000000e+00> : vector<16x128xf32>
    %92 = tpu.matmul %90, %91, %cst_50 {dimension_numbers = #tpu.dot_dimension_numbers<[1], [0], [0], [1], [0, 0, 1, 1], [], []>} : vector<16x128xbf16>, vector<128x128xbf16>, vector<16x128xf32> -> vector<16x128xf32>
    %c0_51 = arith.constant 0 : index
    %c0_52 = arith.constant 0 : index
    %93 = vector.load %arg6[%c0_51, %c0_52] : memref<1x128xf32, #tpu.memory_space<vmem>>, vector<1x128xf32>
    %94 = vector.broadcast %93 : vector<1x128xf32> to vector<16x128xf32>
    %95 = arith.addf %92, %94 : vector<16x128xf32>
    %c0_53 = arith.constant 0 : index
    %c0_54 = arith.constant 0 : index
    %c0_55 = arith.constant 0 : index
    %96 = vector.load %arg7[%c0_53, %c0_54, %c0_55] : memref<1x16x128xf32, #tpu.memory_space<vmem>>, vector<1x16x128xf32>
    %97 = vector.shape_cast %96 : vector<1x16x128xf32> to vector<16x128xf32>
    %98 = vector.shape_cast %95 : vector<16x128xf32> to vector<1x16x128xf32>
    tpu.vector_store %arg7[%c0_53, %c0_54, %c0_55], %98 {strides = array<i32>} : memref<1x16x128xf32, #tpu.memory_space<vmem>>, vector<1x16x128xf32>,
    return
  }
  func.func @transform_0(%arg0: i32) -> (i32, i32, i32) {
    %c0_i32 = arith.constant 0 : i32
    %c0_i32_0 = arith.constant 0 : i32
    %c0_i32_1 = arith.constant 0 : i32
    return %arg0, %c0_i32, %c0_i32_0 : i32, i32, i32
  }
  func.func @transform_1(%arg0: i32) -> (i32, i32) {
    %c0_i32 = arith.constant 0 : i32
    %c0_i32_0 = arith.constant 0 : i32
    %c0_i32_1 = arith.constant 0 : i32
    return %c0_i32, %c0_i32_0 : i32, i32
  }
  func.func @transform_2(%arg0: i32) -> (i32, i32) {
    %c0_i32 = arith.constant 0 : i32
    %c0_i32_0 = arith.constant 0 : i32
    %c0_i32_1 = arith.constant 0 : i32
    return %c0_i32, %c0_i32_0 : i32, i32
  }
  func.func @transform_3(%arg0: i32) -> (i32, i32) {
    %c0_i32 = arith.constant 0 : i32
    %c0_i32_0 = arith.constant 0 : i32
    %c0_i32_1 = arith.constant 0 : i32
    return %c0_i32, %c0_i32_0 : i32, i32
  }
  func.func @transform_4(%arg0: i32) -> (i32, i32) {
    %c0_i32 = arith.constant 0 : i32
    %c0_i32_0 = arith.constant 0 : i32
    %c0_i32_1 = arith.constant 0 : i32
    return %c0_i32, %c0_i32_0 : i32, i32
  }
  func.func @transform_5(%arg0: i32) -> (i32, i32) {
    %c0_i32 = arith.constant 0 : i32
    %c0_i32_0 = arith.constant 0 : i32
    %c0_i32_1 = arith.constant 0 : i32
    return %c0_i32, %c0_i32_0 : i32, i32
  }
  func.func @transform_6(%arg0: i32) -> (i32, i32, i32) {
    %c0_i32 = arith.constant 0 : i32
    %c0_i32_0 = arith.constant 0 : i32
    %c0_i32_1 = arith.constant 0 : i32
    return %arg0, %c0_i32, %c0_i32_0 : i32, i32, i32
  }
}

</mosaic_0001>

<bundles_post_ra>
// kernel: tpu_custom_call.1
= control target key start
LH: loop header
LB: loop body
LE: loop exit
PB: predicated region body
PF: predicated region fallthrough
CT: control target
= control target key end

     0   :  { %11 = vsyncpa [#allocation4], 0  ;;  %s1624_s0 = inlined_call_operand.vmem [shape: bf16[1,128,16], index: 0, kind: input, shape index: {}]   ;;  %s1625_s1 = inlined_call_operand.vmem [shape: bf16[16,128], index: 1, kind: input, shape index: {}]   ;;  %s1626_s2 = inlined_call_operand.vmem [shape: bf16[128,128], index: 2, kind: input, shape index: {}]   ;;  %s1627_s3 = inlined_call_operand.vmem [shape: f32[1,128], index: 3, kind: input, shape index: {}]   ;;  %s1628_s4 = inlined_call_operand.hbm [shape: bf16[128,128], index: 4, kind: input, shape index: {}]   ;;  %s1629_s5 = inlined_call_operand.vmem [shape: f32[1,128], index: 5, kind: input, shape index: {}]   ;;  %s1630_s6 = inlined_call_operand.hbm [shape: f32[1,16,128], index: 6, kind: output, shape index: {}]  }
   0x1   :  { %12 = vsyncpa [#allocation5], 0  ;;  %s1279_s21 = smov [#allocation3]   ;;  %s1231_s25 = scalar_lea.hbm %s1628_s4, 1024 }
   0x2   :  { %s26_s22 = sshll.u32 %s1279_s21, 4  ;;  %p1232_p0 = scmp.ne.s32.totalorder %s1628_s4, %s1231_s25  ;;  %s27_s22 = int_to_ptr.vmem [resolvable:$true] %s26_s22 }
   0x3   :  { %p1235_p1 = scmp.lt.u32.totalorder %s1231_s25, %s1628_s4 }
   0x5   :  { %p1237_p2 = pnand %p1235_p1, %p1232_p0 }
   0x7   :  { %1240 = shalt.err (!%p1237_p2)
}
   0x8   :  { %s1241_s30 = scalar_lea.vmem %s27_s22, 1024  ;;  %p1246_p4 = scmp.lt.s32.totalorder %s27_s22, %s27_s22 }
   0x9   :  { %p1242_p3 = scmp.ne.s32.totalorder %s27_s22, %s1241_s30  ;;  %p1247_p5 = scmp.lt.s32.totalorder %s1241_s30, %s1241_s30 }
   0xb   :  { %p1248_p6 = por %p1247_p5, %p1246_p4 }
   0xd   :  { %p1249_p7 = pnand %p1248_p6, %p1242_p3 }
   0xf   :  { %1252 = shalt.err (!%p1249_p7)
}
  0x10   :  { %s1280_s7 = smov 64   ;;  %s1281_s8 = smov 4  }
  0x11   :  { %32 = dma.hbm_to_vmem [thread:$0]  %s1628_s4, 1024, %s27_s22, [#allocation4], %s1280_s7, %s1280_s7, %s1281_s8  }
  0x12   :  { %1275 = dma.done.wait [#allocation4], 1024  }
  0x13   :  { %1276 = vsyncadd [#allocation4], 4294966272  ;;  %v1282_v0 = vmov 0.0   ;;  %vm1283_vm0 = vmmov 0   ;;  %v1341_v1 = vld [vmem:[%s1626_s2] sm:$0xff]   ;;  %v1347_v2 = vld [vmem:[%s1626_s2 + $0x8] sm:$0xff]  }
  0x14   :  { %985 = vmatprep.subr.bf16.mxu1 %v1282_v0  ;;  %1001 = vmatprep.mubr.msk.bf16.mxu1 %vm1283_vm0, %v1282_v0  ;;  %v1353_v3 = vld [vmem:[%s1626_s2 + $0x10] sm:$0xff]   ;;  %v1179_v4 = vld [vmem:[%s1625_s1] sm:$0xff]   ;;  %vm110_vm1 = vcmask 130048   ;;  %v1182_v6 = vld [vmem:[%s1624_s0 + $0x8] sm:$0xff]   ;;  %v1284_v12 = vmov 0   ;;  %s1285_s19 = smov [#allocation6]  }
  0x15   :  { %986 = vmatpush3.bf16.msra.mxu1 %v1341_v1  ;;  %v1180_v5 = vld [vmem:[%s1624_s0] sm:$0xff]   ;;  %967 = vmatprep.subr.bf16.mxu0 %v1179_v4  ;;  %v1372_v7 = vld [vmem:[%s1626_s2 + $0x18] sm:$0xff]   ;;  %v1388_v9 = vld [vmem:[%s1626_s2 + $0x28] sm:$0xff]   ;;  %s830_s20 = sshll.u32 %s1285_s19, 4  ;;  %s831_s20 = int_to_ptr.vmem [resolvable:$true] %s830_s20 }
  0x16   :  { %987 = vmatprep.subr.bf16.mxu1 %v1282_v0  ;;  %968 = vmatpush3.bf16.msra.mxu0 %v1179_v4  ;;  %v1379_v8 = vld [vmem:[%s1626_s2 + $0x20] sm:$0xff]   ;;  %v1400_v10 = vld [vmem:[%s1626_s2 + $0x30] sm:$0xff]   ;;  %v1409_v11 = vld [vmem:[%s1626_s2 + $0x38] sm:$0xff]   ;;  %s1253_s21 = scalar_lea.vmem %s831_s20, 256  ;;  %p1258_p9 = scmp.lt.s32.totalorder %s831_s20, %s831_s20 }
  0x17   :  { %969 = vmatprep.mubr.msk.bf16.mxu0 %vm110_vm1, %v1180_v5  ;;  %1005 = vmatprep.subr.bf16.mxu0 %v1282_v0  ;;  %v1185_v13 = vld [vmem:[%s1624_s0 + $0x10] sm:$0xff]   ;;  %v1186_v14 = vld [vmem:[%s1624_s0 + $0x18] sm:$0xff]   ;;  %v1187_v15 = vld [vmem:[%s1624_s0 + $0x20] sm:$0xff]   ;;  %p1254_p8 = scmp.ne.s32.totalorder %s831_s20, %s1253_s21  ;;  %p1259_p10 = scmp.lt.s32.totalorder %s1253_s21, %s1253_s21 }
  0x18   :  { %v1188_v16 = vld [vmem:[%s1624_s0 + $0x28] sm:$0xff]   ;;  %v1189_v17 = vld [vmem:[%s1624_s0 + $0x30] sm:$0xff]   ;;  %v1190_v18 = vld [vmem:[%s1624_s0 + $0x38] sm:$0xff]  }
  0x19   :  { %988 = vmatpush3.bf16.msra.mxu1 %v1347_v2  ;;  %970 = vmatmul.mubr.msk.bf16.vlgmr.msra.gmra.mrb[0].mxu0 %vm110_vm1, %v1182_v6  ;;  %v1469_v19 = vld [vmem:[%s1627_s3] ss:$0 sm:$0xff]  ;;  %p1260_p11 = por %p1259_p10, %p1258_p9 }
  0x1a   :  { %989 = vmatprep.subr.bf16.mxu1 %v1282_v0  ;;  %1006 = vmatpush3.bf16.msra.mxu0 %v1341_v1 }
  0x1b   :  { %1007 = vmatprep.subr.bf16.mxu0 %v1282_v0  ;;  %973 = vmatprep.mubr.msk.bf16.mxu0 %vm110_vm1, %v1185_v13  ;;  %p1261_p12 = pnand %p1260_p11, %p1254_p8 }
  0x1d   :  { %990 = vmatpush3.bf16.msra.mxu1 %v1353_v3 }
  0x1e   :  { %991 = vmatprep.subr.bf16.mxu1 %v1282_v0  ;;  %1008 = vmatpush3.bf16.msra.mxu0 %v1347_v2 }
  0x1f   :  { %1009 = vmatprep.subr.bf16.mxu0 %v1282_v0 }
  0x21   :  { %992 = vmatpush3.bf16.msra.mxu1 %v1372_v7  ;;  %974 = vmatmul.mubr.msk.bf16.gmra.mrb[4].mxu0 %vm110_vm1, %v1186_v14 }
  0x22   :  { %993 = vmatprep.subr.bf16.mxu1 %v1282_v0  ;;  %1010 = vmatpush3.bf16.msra.mxu0 %v1353_v3 }
  0x23   :  { %1011 = vmatprep.subr.bf16.mxu0 %v1282_v0  ;;  %977 = vmatprep.mubr.msk.bf16.mxu0 %vm110_vm1, %v1187_v15 }
  0x25   :  { %994 = vmatpush3.bf16.msra.mxu1 %v1379_v8 }
  0x26   :  { %995 = vmatprep.subr.bf16.mxu1 %v1282_v0  ;;  %1012 = vmatpush3.bf16.msra.mxu0 %v1372_v7 }
  0x27   :  { %1013 = vmatprep.subr.bf16.mxu0 %v1282_v0 }
  0x29   :  { %996 = vmatpush3.bf16.msra.mxu1 %v1388_v9  ;;  %978 = vmatmul.mubr.msk.bf16.gmra.mrb[8].mxu0 %vm110_vm1, %v1188_v16 }
  0x2a   :  { %997 = vmatprep.subr.bf16.mxu1 %v1282_v0  ;;  %1014 = vmatpush3.bf16.msra.mxu0 %v1379_v8 }
  0x2b   :  { %1015 = vmatprep.subr.bf16.mxu0 %v1282_v0  ;;  %981 = vmatprep.mubr.msk.bf16.mxu0 %vm110_vm1, %v1189_v17 }
  0x2d   :  { %998 = vmatpush3.bf16.msra.mxu1 %v1400_v10 }
  0x2e   :  { %999 = vmatprep.subr.bf16.mxu1 %v1282_v0  ;;  %1016 = vmatpush3.bf16.msra.mxu0 %v1388_v9 }
  0x2f   :  { %1017 = vmatprep.subr.bf16.mxu0 %v1282_v0 }
  0x31   :  { %1000 = vmatpush3.bf16.msra.mxu1 %v1409_v11  ;;  %982 = vmatmul.mubr.msk.bf16.gmra.mrb[12].mxu0 %vm110_vm1, %v1190_v18 }
  0x32   :  { %1025 = vmatprep.subr.bf16.mxu1 %v1282_v0  ;;  %1018 = vmatpush3.bf16.msra.mxu0 %v1400_v10 }
  0x33   :  { %1019 = vmatprep.subr.bf16.mxu0 %v1282_v0  ;;  %1021 = vmatprep.mubr.msk.bf16.mxu0 %vm1283_vm0, %v1282_v0 }
  0x34   :  { %1002 = vmatmul.mubr.bf16.vlgmr.msra.gmra.mrb[0].mxu1 %v1284_v12 }
  0x35   :  { %1026 = vmatpush3.bf16.msra.mxu1 %v1341_v1  ;;  %1041 = vmatprep.mubr.msk.bf16.mxu1 %vm1283_vm0, %v1282_v0 }
  0x36   :  { %1027 = vmatprep.subr.bf16.mxu1 %v1282_v0  ;;  %1020 = vmatpush3.bf16.msra.mxu0 %v1409_v11 }
  0x37   :  { %1045 = vmatprep.subr.bf16.mxu0 %v1282_v0 }
  0x39   :  { %1028 = vmatpush3.bf16.msra.mxu1 %v1347_v2 }
  0x3a   :  { %1029 = vmatprep.subr.bf16.mxu1 %v1282_v0 }
  0x3d   :  { %1030 = vmatpush3.bf16.msra.mxu1 %v1353_v3 }
  0x3e   :  { %1031 = vmatprep.subr.bf16.mxu1 %v1282_v0 }
  0x41   :  { %1032 = vmatpush3.bf16.msra.mxu1 %v1372_v7 }
  0x42   :  { %1033 = vmatprep.subr.bf16.mxu1 %v1282_v0 }
  0x45   :  { %1034 = vmatpush3.bf16.msra.mxu1 %v1379_v8 }
  0x46   :  { %1035 = vmatprep.subr.bf16.mxu1 %v1282_v0 }
  0x49   :  { %1036 = vmatpush3.bf16.msra.mxu1 %v1388_v9 }
  0x4a   :  { %1037 = vmatprep.subr.bf16.mxu1 %v1282_v0 }
  0x4d   :  { %1038 = vmatpush3.bf16.msra.mxu1 %v1400_v10 }
  0x4e   :  { %1039 = vmatprep.subr.bf16.mxu1 %v1282_v0 }
  0x51   :  { %1040 = vmatpush3.bf16.msra.mxu1 %v1409_v11 }
  0x52   :  { %1065 = vmatprep.subr.bf16.mxu1 %v1282_v0 }
  0xec   :  { %v971_v20 = vpop.f32.mrb[0].mxu0 }
  0xed   :  { %v178_v21 = vadd.f32 %v971_v20, %v1469_v19  ;;  %v169_v22 = vpop.f32.mrb[1].mxu0 }
  0xee   :  { %v170_v23 = vadd.f32 %v1469_v19, %v169_v22  ;;  %v972_v24 = vpop.f32.mrb[2].mxu0 }
  0xef   :  { %v181_v25 = vadd.f32 %v972_v24, %v1469_v19  ;;  %v172_v26 = vpop.f32.mrb[3].mxu0 }
  0xf0   :  { %v173_v27 = vadd.f32 %v1469_v19, %v172_v26 }
  0xf1   :  { %v1475_v28 = vpack.c.bf16 %v181_v25, %v178_v21 }
  0xf2   :  { %v232_v29 = vpack.c.bf16 %v173_v27, %v170_v23 }
  0xf3   :  { %v362_v16 = vunpack.c.l.bf16 %v1475_v28  ;;  %v363_v21 = vunpack.c.h.bf16 %v1475_v28 }
  0xf4   :  { %v249_v30 = vunpack.c.l.bf16 %v232_v29  ;;  %v250_v34 = vunpack.c.h.bf16 %v232_v29  ;;  %v975_v41 = vpop.f32.mrb[4].mxu0 }
  0xf5   :  { %v194_v42 = vadd.f32 %v975_v41, %v1469_v19  ;;  %v185_v43 = vpop.f32.mrb[5].mxu0 }
  0xf6   :  { %v186_v44 = vadd.f32 %v1469_v19, %v185_v43  ;;  %v976_v45 = vpop.f32.mrb[6].mxu0 }
  0xf7   :  { %v197_v46 = vadd.f32 %v976_v45, %v1469_v19  ;;  %v188_v47 = vpop.f32.mrb[7].mxu0 }
  0xf8   :  { %v189_v48 = vadd.f32 %v1469_v19, %v188_v47 }
  0xf9   :  { %v1499_v49 = vpack.c.bf16 %v197_v46, %v194_v42 }
  0xfa   :  { %v234_v50 = vpack.c.bf16 %v189_v48, %v186_v44 }
  0xfb   :  { %v463_v42 = vunpack.c.h.bf16 %v1499_v49 }
  0xfc   :  { %v979_v51 = vpop.f32.mrb[8].mxu0 }
  0xfd   :  { %v210_v52 = vadd.f32 %v979_v51, %v1469_v19  ;;  %v201_v53 = vpop.f32.mrb[9].mxu0 }
  0xfe   :  { %v202_v54 = vadd.f32 %v1469_v19, %v201_v53  ;;  %v980_v55 = vpop.f32.mrb[10].mxu0 }
  0xff   :  { %v213_v56 = vadd.f32 %v980_v55, %v1469_v19  ;;  %v204_v57 = vpop.f32.mrb[11].mxu0 }
 0x100   :  { %v205_v58 = vadd.f32 %v1469_v19, %v204_v57 }
 0x101   :  { %v1505_v59 = vpack.c.bf16 %v213_v56, %v210_v52 }
 0x102   :  { %v1507_v60 = vpack.c.bf16 %v205_v58, %v202_v54 }
 0x104   :  { %v983_v61 = vpop.f32.mrb[12].mxu0  ;;  %v513_v53 = vunpack.c.h.bf16 %v1507_v60 }
 0x105   :  { %v226_v62 = vadd.f32 %v983_v61, %v1469_v19  ;;  %v217_v63 = vpop.f32.mrb[13].mxu0 }
 0x106   :  { %v218_v4 = vadd.f32 %v1469_v19, %v217_v63  ;;  %v984_v5 = vpop.f32.mrb[14].mxu0 }
 0x107   :  { %v349_v31 = vpop.f32.mrb[0].mxu1  ;;  %v229_v6 = vadd.f32 %v984_v5, %v1469_v19  ;;  %v220_v12 = vpop.f32.mrb[15].mxu0 }
 0x108   :  { %v356_v32 = vadd.f32 %v349_v31, %v249_v30  ;;  %v1003_v33 = vpop.f32.mrb[1].mxu1  ;;  %v221_v13 = vadd.f32 %v1469_v19, %v220_v12  ;;  %v412_v19 = vunpack.c.l.bf16 %v234_v50  ;;  %v413_v31 = vunpack.c.h.bf16 %v234_v50 }
 0x109   :  { %v352_v35 = vpop.f32.mrb[2].mxu1  ;;  %v1513_v14 = vpack.c.bf16 %v229_v6, %v226_v62  ;;  %v1193_v6 = vld [vmem:[#allocation3 + $0x10] sm:$0xff]  }
 0x10a   :  { %v357_v36 = vadd.f32 %v352_v35, %v250_v34  ;;  %v1004_v37 = vpop.f32.mrb[3].mxu1  ;;  %1199 = vtanh.f32 %v356_v32  ;;  %v1515_v15 = vpack.c.bf16 %v221_v13, %v218_v4 }
 0x10c   :  { %1201 = vtanh.f32 %v357_v36  ;;  %v612_v12 = vunpack.c.l.bf16 %v1515_v15 }
 0x114   :  { %v1200_v38 = vpop.eup %1199 }
 0x116   :  { %v1202_v39 = vpop.eup %1201 }
 0x117   :  { %v364_v40 = vpack.c.bf16 %v1202_v39, %v1200_v38  ;;  %v462_v38 = vunpack.c.l.bf16 %v1499_v49  ;;  %v512_v49 = vunpack.c.l.bf16 %v1507_v60  ;;  %v563_v60 = vunpack.c.h.bf16 %v1505_v59 }
 0x119   :  { %1022 = vmatmul.mubr.bf16.vlgmr.msra.gmra.mrb[16].mxu0 %v364_v40 }
 0x11a   :  { %1046 = vmatpush3.bf16.msra.mxu0 %v1341_v1  ;;  %1061 = vmatprep.mubr.msk.bf16.mxu0 %vm1283_vm0, %v1282_v0 }
 0x11b   :  { %1047 = vmatprep.subr.bf16.mxu0 %v1282_v0 }
 0x11e   :  { %1048 = vmatpush3.bf16.msra.mxu0 %v1347_v2 }
 0x11f   :  { %1049 = vmatprep.subr.bf16.mxu0 %v1282_v0 }
 0x122   :  { %1050 = vmatpush3.bf16.msra.mxu0 %v1353_v3 }
 0x123   :  { %1051 = vmatprep.subr.bf16.mxu0 %v1282_v0 }
 0x126   :  { %1052 = vmatpush3.bf16.msra.mxu0 %v1372_v7 }
 0x127   :  { %1053 = vmatprep.subr.bf16.mxu0 %v1282_v0 }
 0x12a   :  { %1054 = vmatpush3.bf16.msra.mxu0 %v1379_v8 }
 0x12b   :  { %1055 = vmatprep.subr.bf16.mxu0 %v1282_v0 }
 0x12e   :  { %1056 = vmatpush3.bf16.msra.mxu0 %v1388_v9 }
 0x12f   :  { %1057 = vmatprep.subr.bf16.mxu0 %v1282_v0 }
 0x132   :  { %1058 = vmatpush3.bf16.msra.mxu0 %v1400_v10 }
 0x133   :  { %1059 = vmatprep.subr.bf16.mxu0 %v1282_v0 }
 0x136   :  { %1060 = vmatpush3.bf16.msra.mxu0 %v1409_v11 }
 0x137   :  { %1085 = vmatprep.subr.bf16.mxu0 %v1282_v0 }
 0x1ec   :  { %v399_v17 = vpop.f32.mrb[16].mxu0 }
 0x1ed   :  { %v406_v18 = vadd.f32 %v399_v17, %v362_v16  ;;  %v1023_v20 = vpop.f32.mrb[17].mxu0 }
 0x1ee   :  { %v402_v22 = vpop.f32.mrb[18].mxu0 }
 0x1ef   :  { %v407_v23 = vadd.f32 %v402_v22, %v363_v21  ;;  %v1024_v24 = vpop.f32.mrb[19].mxu0  ;;  %1203 = vtanh.f32 %v406_v18  ;;  %v613_v18 = vunpack.c.h.bf16 %v1515_v15  ;;  %v1198_v15 = vld [vmem:[#allocation3 + $0x38] sm:$0xff]  }
 0x1f1   :  { %1205 = vtanh.f32 %v407_v23 }
 0x1f9   :  { %v1204_v25 = vpop.eup %1203 }
 0x1fb   :  { %v1206_v26 = vpop.eup %1205 }
 0x1fc   :  { %v414_v27 = vpack.c.bf16 %v1206_v26, %v1204_v25  ;;  %v1195_v26 = vld [vmem:[#allocation3 + $0x20] sm:$0xff]  }
 0x1fe   :  { %1042 = vmatmul.mubr.bf16.vlgmr.msra.gmra.mrb[4].mxu1 %v414_v27  ;;  %v1196_v27 = vld [vmem:[#allocation3 + $0x28] sm:$0xff]  }
 0x1ff   :  { %1066 = vmatpush3.bf16.msra.mxu1 %v1341_v1  ;;  %1081 = vmatprep.mubr.msk.bf16.mxu1 %vm1283_vm0, %v1282_v0 }
 0x200   :  { %1067 = vmatprep.subr.bf16.mxu1 %v1282_v0 }
 0x203   :  { %1068 = vmatpush3.bf16.msra.mxu1 %v1347_v2 }
 0x204   :  { %1069 = vmatprep.subr.bf16.mxu1 %v1282_v0 }
 0x207   :  { %1070 = vmatpush3.bf16.msra.mxu1 %v1353_v3 }
 0x208   :  { %1071 = vmatprep.subr.bf16.mxu1 %v1282_v0 }
 0x20b   :  { %1072 = vmatpush3.bf16.msra.mxu1 %v1372_v7 }
 0x20c   :  { %1073 = vmatprep.subr.bf16.mxu1 %v1282_v0 }
 0x20f   :  { %1074 = vmatpush3.bf16.msra.mxu1 %v1379_v8 }
 0x210   :  { %1075 = vmatprep.subr.bf16.mxu1 %v1282_v0 }
 0x213   :  { %1076 = vmatpush3.bf16.msra.mxu1 %v1388_v9 }
 0x214   :  { %1077 = vmatprep.subr.bf16.mxu1 %v1282_v0 }
 0x217   :  { %1078 = vmatpush3.bf16.msra.mxu1 %v1400_v10 }
 0x218   :  { %1079 = vmatprep.subr.bf16.mxu1 %v1282_v0 }
 0x21b   :  { %1080 = vmatpush3.bf16.msra.mxu1 %v1409_v11 }
 0x21c   :  { %1105 = vmatprep.subr.bf16.mxu1 %v1282_v0 }
 0x2d1   :  { %v449_v28 = vpop.f32.mrb[4].mxu1 }
 0x2d2   :  { %v456_v29 = vadd.f32 %v449_v28, %v412_v19  ;;  %v1043_v30 = vpop.f32.mrb[5].mxu1  ;;  %v1197_v19 = vld [vmem:[#allocation3 + $0x30] sm:$0xff]   ;;  %v662_v28 = vunpack.c.l.bf16 %v1513_v14 }
 0x2d3   :  { %v452_v32 = vpop.f32.mrb[6].mxu1 }
 0x2d4   :  { %v457_v33 = vadd.f32 %v452_v32, %v413_v31  ;;  %v1044_v34 = vpop.f32.mrb[7].mxu1  ;;  %1207 = vtanh.f32 %v456_v29  ;;  %v663_v32 = vunpack.c.h.bf16 %v1513_v14 }
 0x2d6   :  { %1209 = vtanh.f32 %v457_v33 }
 0x2de   :  { %v1208_v35 = vpop.eup %1207 }
 0x2e0   :  { %v1210_v36 = vpop.eup %1209 }
 0x2e1   :  { %v464_v37 = vpack.c.bf16 %v1210_v36, %v1208_v35 }
 0x2e3   :  { %1062 = vmatmul.mubr.bf16.vlgmr.msra.gmra.mrb[20].mxu0 %v464_v37 }
 0x2e4   :  { %1086 = vmatpush3.bf16.msra.mxu0 %v1341_v1  ;;  %1101 = vmatprep.mubr.msk.bf16.mxu0 %vm1283_vm0, %v1282_v0 }
 0x2e5   :  { %1087 = vmatprep.subr.bf16.mxu0 %v1282_v0 }
 0x2e8   :  { %1088 = vmatpush3.bf16.msra.mxu0 %v1347_v2 }
 0x2e9   :  { %1089 = vmatprep.subr.bf16.mxu0 %v1282_v0 }
 0x2ec   :  { %1090 = vmatpush3.bf16.msra.mxu0 %v1353_v3 }
 0x2ed   :  { %1091 = vmatprep.subr.bf16.mxu0 %v1282_v0 }
 0x2f0   :  { %1092 = vmatpush3.bf16.msra.mxu0 %v1372_v7 }
 0x2f1   :  { %1093 = vmatprep.subr.bf16.mxu0 %v1282_v0 }
 0x2f4   :  { %1094 = vmatpush3.bf16.msra.mxu0 %v1379_v8 }
 0x2f5   :  { %1095 = vmatprep.subr.bf16.mxu0 %v1282_v0 }
 0x2f8   :  { %1096 = vmatpush3.bf16.msra.mxu0 %v1388_v9 }
 0x2f9   :  { %1097 = vmatprep.subr.bf16.mxu0 %v1282_v0 }
 0x2fc   :  { %1098 = vmatpush3.bf16.msra.mxu0 %v1400_v10 }
 0x2fd   :  { %1099 = vmatprep.subr.bf16.mxu0 %v1282_v0 }
 0x300   :  { %1100 = vmatpush3.bf16.msra.mxu0 %v1409_v11 }
 0x301   :  { %1125 = vmatprep.subr.bf16.mxu0 %v1282_v0 }
 0x3b6   :  { %v499_v39 = vpop.f32.mrb[20].mxu0 }
 0x3b7   :  { %v506_v40 = vadd.f32 %v499_v39, %v462_v38  ;;  %v1063_v41 = vpop.f32.mrb[21].mxu0 }
 0x3b8   :  { %v502_v43 = vpop.f32.mrb[22].mxu0 }
 0x3b9   :  { %v507_v44 = vadd.f32 %v502_v43, %v463_v42  ;;  %v1064_v45 = vpop.f32.mrb[23].mxu0  ;;  %1211 = vtanh.f32 %v506_v40 }
 0x3bb   :  { %1213 = vtanh.f32 %v507_v44 }
 0x3c3   :  { %v1212_v46 = vpop.eup %1211 }
 0x3c5   :  { %v1214_v47 = vpop.eup %1213 }
 0x3c6   :  { %v514_v48 = vpack.c.bf16 %v1214_v47, %v1212_v46 }
 0x3c8   :  { %1082 = vmatmul.mubr.bf16.vlgmr.msra.gmra.mrb[8].mxu1 %v514_v48 }
 0x3c9   :  { %1106 = vmatpush3.bf16.msra.mxu1 %v1341_v1  ;;  %1121 = vmatprep.mubr.msk.bf16.mxu1 %vm1283_vm0, %v1282_v0 }
 0x3ca   :  { %1107 = vmatprep.subr.bf16.mxu1 %v1282_v0 }
 0x3cd   :  { %1108 = vmatpush3.bf16.msra.mxu1 %v1347_v2 }
 0x3ce   :  { %1109 = vmatprep.subr.bf16.mxu1 %v1282_v0 }
 0x3d1   :  { %1110 = vmatpush3.bf16.msra.mxu1 %v1353_v3 }
 0x3d2   :  { %1111 = vmatprep.subr.bf16.mxu1 %v1282_v0 }
 0x3d5   :  { %1112 = vmatpush3.bf16.msra.mxu1 %v1372_v7 }
 0x3d6   :  { %1113 = vmatprep.subr.bf16.mxu1 %v1282_v0 }
 0x3d9   :  { %1114 = vmatpush3.bf16.msra.mxu1 %v1379_v8 }
 0x3da   :  { %1115 = vmatprep.subr.bf16.mxu1 %v1282_v0 }
 0x3dd   :  { %1116 = vmatpush3.bf16.msra.mxu1 %v1388_v9 }
 0x3de   :  { %1117 = vmatprep.subr.bf16.mxu1 %v1282_v0 }
 0x3e1   :  { %1118 = vmatpush3.bf16.msra.mxu1 %v1400_v10 }
 0x3e2   :  { %1119 = vmatprep.subr.bf16.mxu1 %v1282_v0 }
 0x3e5   :  { %1120 = vmatpush3.bf16.msra.mxu1 %v1409_v11 }
 0x3e6   :  { %1145 = vmatprep.subr.bf16.mxu1 %v1282_v0 }
 0x49b   :  { %v549_v50 = vpop.f32.mrb[8].mxu1 }
 0x49c   :  { %v556_v51 = vadd.f32 %v549_v50, %v512_v49  ;;  %v1083_v52 = vpop.f32.mrb[9].mxu1 }
 0x49d   :  { %v552_v54 = vpop.f32.mrb[10].mxu1 }
 0x49e   :  { %v557_v55 = vadd.f32 %v552_v54, %v513_v53  ;;  %v1084_v56 = vpop.f32.mrb[11].mxu1  ;;  %1215 = vtanh.f32 %v556_v51 }
 0x4a0   :  { %1217 = vtanh.f32 %v557_v55 }
 0x4a8   :  { %v1216_v57 = vpop.eup %1215 }
 0x4aa   :  { %v1218_v58 = vpop.eup %1217 }
 0x4ab   :  { %v564_v61 = vpack.c.bf16 %v1218_v58, %v1216_v57 }
 0x4ad   :  { %1102 = vmatmul.mubr.bf16.vlgmr.msra.gmra.mrb[24].mxu0 %v564_v61 }
 0x4ae   :  { %1126 = vmatpush3.bf16.msra.mxu0 %v1341_v1  ;;  %1141 = vmatprep.mubr.msk.bf16.mxu0 %vm1283_vm0, %v1282_v0  ;;  %v562_v1 = vunpack.c.l.bf16 %v1505_v59  ;;  %v1194_v59 = vld [vmem:[#allocation3 + $0x18] sm:$0xff]  }
 0x4af   :  { %1127 = vmatprep.subr.bf16.mxu0 %v1282_v0 }
 0x4b2   :  { %1128 = vmatpush3.bf16.msra.mxu0 %v1347_v2 }
 0x4b3   :  { %1129 = vmatprep.subr.bf16.mxu0 %v1282_v0 }
 0x4b6   :  { %1130 = vmatpush3.bf16.msra.mxu0 %v1353_v3 }
 0x4b7   :  { %1131 = vmatprep.subr.bf16.mxu0 %v1282_v0 }
 0x4ba   :  { %1132 = vmatpush3.bf16.msra.mxu0 %v1372_v7 }
 0x4bb   :  { %1133 = vmatprep.subr.bf16.mxu0 %v1282_v0 }
 0x4be   :  { %1134 = vmatpush3.bf16.msra.mxu0 %v1379_v8 }
 0x4bf   :  { %1135 = vmatprep.subr.bf16.mxu0 %v1282_v0 }
 0x4c2   :  { %1136 = vmatpush3.bf16.msra.mxu0 %v1388_v9 }
 0x4c3   :  { %1137 = vmatprep.subr.bf16.mxu0 %v1282_v0 }
 0x4c6   :  { %1138 = vmatpush3.bf16.msra.mxu0 %v1400_v10  ;;  %v1191_v10 = vld [vmem:[#allocation3] sm:$0xff]  }
 0x4c7   :  { %1139 = vmatprep.subr.bf16.mxu0 %v1282_v0 }
 0x4ca   :  { %1140 = vmatpush3.bf16.msra.mxu0 %v1409_v11  ;;  %v1192_v11 = vld [vmem:[#allocation3 + $0x8] sm:$0xff]  }
 0x580   :  { %v599_v2 = vpop.f32.mrb[24].mxu0 }
 0x581   :  { %v606_v3 = vadd.f32 %v599_v2, %v562_v1  ;;  %v1103_v7 = vpop.f32.mrb[25].mxu0 }
 0x582   :  { %v602_v8 = vpop.f32.mrb[26].mxu0 }
 0x583   :  { %v607_v62 = vadd.f32 %v602_v8, %v563_v60  ;;  %v1104_v63 = vpop.f32.mrb[27].mxu0  ;;  %1219 = vtanh.f32 %v606_v3 }
 0x585   :  { %1221 = vtanh.f32 %v607_v62 }
 0x58d   :  { %v1220_v9 = vpop.eup %1219 }
 0x58f   :  { %v1222_v4 = vpop.eup %1221 }
 0x590   :  { %v614_v5 = vpack.c.bf16 %v1222_v4, %v1220_v9 }
 0x592   :  { %1122 = vmatmul.mubr.bf16.vlgmr.msra.gmra.mrb[12].mxu1 %v614_v5 }
 0x593   :  { %1161 = vmatprep.mubr.msk.bf16.mxu1 %vm1283_vm0, %v1282_v0  ;;  %1146 = vmatpush3.bf16.msra.mxu1 %v1191_v10 }
 0x594   :  { %1147 = vmatprep.subr.bf16.mxu1 %v1282_v0 }
 0x597   :  { %1148 = vmatpush3.bf16.msra.mxu1 %v1192_v11 }
 0x598   :  { %1149 = vmatprep.subr.bf16.mxu1 %v1282_v0 }
 0x59b   :  { %1150 = vmatpush3.bf16.msra.mxu1 %v1193_v6 }
 0x59c   :  { %1151 = vmatprep.subr.bf16.mxu1 %v1282_v0 }
 0x59f   :  { %1152 = vmatpush3.bf16.msra.mxu1 %v1194_v59 }
 0x5a0   :  { %1153 = vmatprep.subr.bf16.mxu1 %v1282_v0 }
 0x5a3   :  { %1154 = vmatpush3.bf16.msra.mxu1 %v1195_v26 }
 0x5a4   :  { %1155 = vmatprep.subr.bf16.mxu1 %v1282_v0 }
 0x5a7   :  { %1156 = vmatpush3.bf16.msra.mxu1 %v1196_v27 }
 0x5a8   :  { %1157 = vmatprep.subr.bf16.mxu1 %v1282_v0 }
 0x5ab   :  { %1158 = vmatpush3.bf16.msra.mxu1 %v1197_v19 }
 0x5ac   :  { %1159 = vmatprep.subr.bf16.mxu1 %v1282_v0  ;;  %v868_v0 = vld [vmem:[%s1629_s5] ss:$0 sm:$0xff] }
 0x5af   :  { %1160 = vmatpush3.bf16.msra.mxu1 %v1198_v15 }
 0x665   :  { %v649_v13 = vpop.f32.mrb[12].mxu1 }
 0x666   :  { %v656_v16 = vadd.f32 %v649_v13, %v612_v12  ;;  %v1123_v17 = vpop.f32.mrb[13].mxu1 }
 0x667   :  { %v652_v20 = vpop.f32.mrb[14].mxu1 }
 0x668   :  { %v657_v21 = vadd.f32 %v652_v20, %v613_v18  ;;  %v1124_v22 = vpop.f32.mrb[15].mxu1  ;;  %1223 = vtanh.f32 %v656_v16 }
 0x66a   :  { %1225 = vtanh.f32 %v657_v21 }
 0x672   :  { %v1224_v23 = vpop.eup %1223 }
 0x674   :  { %v1226_v24 = vpop.eup %1225 }
 0x675   :  { %v664_v25 = vpack.c.bf16 %v1226_v24, %v1224_v23 }
 0x677   :  { %1142 = vmatmul.mubr.bf16.vlgmr.msra.gmra.mrb[28].mxu0 %v664_v25 }
 0x74a   :  { %v699_v29 = vpop.f32.mrb[28].mxu0 }
 0x74b   :  { %v706_v30 = vadd.f32 %v699_v29, %v662_v28  ;;  %v1143_v31 = vpop.f32.mrb[29].mxu0 }
 0x74c   :  { %v702_v33 = vpop.f32.mrb[30].mxu0 }
 0x74d   :  { %v707_v34 = vadd.f32 %v702_v33, %v663_v32  ;;  %v1144_v35 = vpop.f32.mrb[31].mxu0  ;;  %1227 = vtanh.f32 %v706_v30 }
 0x74f   :  { %1229 = vtanh.f32 %v707_v34 }
 0x757   :  { %v1228_v36 = vpop.eup %1227 }
 0x759   :  { %v1230_v37 = vpop.eup %1229 }
 0x75a   :  { %v710_v38 = vpack.c.bf16 %v1230_v37, %v1228_v36 }
 0x75c   :  { %1162 = vmatmul.mubr.bf16.vlgmr.msra.gmra.mrb[16].mxu1 %v710_v38 }
 0x82f   :  { %v816_v39 = vpop.f32.mrb[16].mxu1 }
 0x830   :  { %v817_v40 = vadd.f32 %v868_v0, %v816_v39  ;;  %v1163_v41 = vpop.f32.mrb[17].mxu1 }
 0x831   :  { %v819_v42 = vpop.f32.mrb[18].mxu1 }
 0x832   :  { %823 = vst [vmem:[#allocation6] sm:$0xff] %v817_v40  ;;  %v820_v14 = vadd.f32 %v868_v0, %v819_v42  ;;  %v1164_v43 = vpop.f32.mrb[19].mxu1 }
 0x834   :  { %824 = vst [vmem:[#allocation6 + $0x8] sm:$0xff] %v820_v14 }
 0x835   :  { %1264 = shalt.err (!%p1261_p12)
}
 0x836   :  { %s1265_s22 = scalar_lea.hbm %s1630_s6, 256 }
 0x837   :  { %p1266_p13 = scmp.ne.s32.totalorder %s1630_s6, %s1265_s22  ;;  %p1269_p0 = scmp.lt.u32.totalorder %s1265_s22, %s1630_s6 }
 0x839   :  { %p1271_p1 = pnand %p1269_p0, %p1266_p13 }
 0x83b   :  { %1274 = shalt.err (!%p1271_p1)
}
 0x83c   :  { %s1286_s27 = smov 128   ;;  %s1287_s28 = smov 8  }
 0x83d   :  { %836 = dma.vmem_to_hbm [thread:$0]  %s831_s20, 256, %s1630_s6, [#allocation5], %s1286_s27, %s1286_s27, %s1287_s28  }
 0x83e   :  { %1277 = dma.done.wait [#allocation5], 256  }
 0x83f   :  { %1278 = vsyncadd [#allocation5], 4294967040 }
 0x840   :  { %840 = vsyncpa [#allocation4], 1 }
 0x841   :  { %841 = vsyncpa [#allocation5], 1 }

</bundles_post_ra>
